<compile_context>
chip_gen: v5e
topology: v5e:2x2
jax: 0.10.0
libtpu: 0.0.40
codegen_flags: <defaults>
</compile_context>

<pallas_src>
import functools

import jax
import jax.numpy as jnp
from jax.experimental import pallas as pl
from jax.experimental.pallas import tpu as pltpu


def _round_up(x: int, m: int) -> int:
    return (x + m - 1) // m * m


def _patch_embed_kernel(a_ref, w_ref, b_ref, o_ref):
    # a_ref: (TM, K_pad) patch-matrix tile (streamed)
    # w_ref: (K_pad, TN) flattened conv weight tile (resident when TN == E_pad)
    # b_ref: (1, TN)     bias tile, float32 (resident when TN == E_pad)
    # o_ref: (TM, TN)    output tile
    acc = jnp.dot(a_ref[...], w_ref[...], preferred_element_type=jnp.float32)
    o_ref[...] = (acc + b_ref[...]).astype(o_ref.dtype)


def prepare_patch_embed_params(weight, bias, *, compute_dtype=jnp.bfloat16):
    """One-time parameter prep (hoisted off the per-call latency path).

    weight: (E, C, P, P) PyTorch Conv2d weight -> (K_pad, E_pad) matmul weight.
    bias:   (E,) -> (1, E_pad) float32 (bias add stays in f32).
    compute_dtype=jnp.bfloat16 is the recommended fast path (MXU-native,
    f32 accumulation); pass jnp.float32 for exact PyTorch Conv2d numerics.
    """
    E, C, P, _ = weight.shape
    K = C * P * P
    K_pad = _round_up(K, 128)
    E_pad = _round_up(E, 128)
    w = weight.reshape(E, K).T  # (K, E); done once, not per call
    if compute_dtype is not None:
        w = w.astype(compute_dtype)
    w = jnp.pad(w, ((0, K_pad - K), (0, E_pad - E)))
    b = jnp.pad(bias.astype(jnp.float32).reshape(1, E), ((0, 0), (0, E_pad - E)))
    return w, b


def _vmem_capacity_bytes() -> int:
    """Physical VMEM per TensorCore; conservative 64 MiB (v7x) fallback."""
    try:
        cap = int(pltpu.get_tpu_info().vmem_capacity_bytes)
        if cap > 0:
            return cap
    except Exception:
        pass
    return 64 * 1024 * 1024


def _select_tiling(M, K_pad, E_pad, a_item, w_item, o_item, budget_bytes):
    """Pick (TM, TN, M_pad).

    - TN = E_pad (weight resident) unless the resident weight + minimal tiles
      exceed the budget, in which case the E axis is tiled (v7x 64 MiB case).
    - TM = largest 128-multiple fitting the budget, clamped so the M grid has
      >=2 steps (megacore) and chosen to minimize M over-padding.
    """
    M128 = _round_up(max(M, 1), 128)

    def vmem_need(tm, tn):
        return (2 * tm * K_pad * a_item      # A tiles, double-buffered
                + 2 * K_pad * tn * w_item    # weight (conservative: 2 buffers)
                + 2 * 8 * tn * 4             # bias (f32, sublane-padded)
                + 2 * tm * tn * o_item)      # output tiles, double-buffered

    # E tiling only as a fallback; prefer a fully resident weight.
    tn = E_pad
    while tn > 128 and vmem_need(128, tn) > budget_bytes:
        tn -= 128
    if vmem_need(128, tn) > budget_bytes:
        raise ValueError(
            f"PatchEmbed GEMM cannot fit VMEM budget {budget_bytes} bytes even "
            f"with 128x128 tiles (K_pad={K_pad}, E_pad={E_pad}).")

    # Largest feasible TM (128-multiple, <=1024, <= M128).
    tm_cap = min(1024, M128)
    # Keep >=2 grid steps along M when possible so both v7x TensorCores work.
    if M128 >= 256:
        tm_cap = min(tm_cap, max(128, (M128 // 2) // 128 * 128))
    tm_max = 128
    t = 128
    while t <= tm_cap:
        if vmem_need(t, tn) <= budget_bytes:
            tm_max = t
        t += 128

    # Among feasible TMs minimize M over-padding (junk DMA/MXU rows); on ties
    # prefer the larger TM (fewer ~0.35us grid steps).
    best_tm, best_pad = 128, _round_up(M128, 128)
    for t in range(128, tm_max + 1, 128):
        pad = _round_up(M128, t)
        if pad < best_pad or (pad == best_pad and t > best_tm):
            best_tm, best_pad = t, pad
    return best_tm, tn, best_pad


@functools.partial(
    jax.jit,
    static_argnames=("patch_size", "embed_dim", "compute_dtype", "out_dtype"))
def patch_embed_forward(x, w_mat, b_mat, *, patch_size, embed_dim,
                        compute_dtype=jnp.bfloat16, out_dtype=None):
    """x: (B, C, H, W) NCHW. w_mat/b_mat from prepare_patch_embed_params.
    Returns (B, num_patches, embed_dim), matching PyTorch PatchEmbed.forward.
    out_dtype defaults to compute_dtype (bf16 writeback halves HBM bytes)."""
    B, C, H, W = x.shape
    P = patch_size
    assert H % P == 0 and W % P == 0
    hp, wp = H // P, W // P
    num_patches = hp * wp
    E = embed_dim
    K = C * P * P
    K_pad, E_pad = w_mat.shape
    M = B * num_patches
    if out_dtype is None:
        out_dtype = compute_dtype if compute_dtype is not None else x.dtype

    # Patch extraction in (c, ph, pw) order to match Conv2d weight layout.
    # (B,C,H,W) -> (B,hp,wp,C,P,P) -> (M, K).  allow_input_fusion lets XLA fuse
    # this chain + pad into the pallas_call input (see TODO at top of file).
    patches = x.reshape(B, C, hp, P, wp, P).transpose(0, 2, 4, 1, 3, 5)
    A = patches.reshape(M, K)
    if compute_dtype is not None:
        A = A.astype(compute_dtype)

    a_item = A.dtype.itemsize
    w_item = w_mat.dtype.itemsize
    o_item = jnp.dtype(out_dtype).itemsize

    # Per-generation VMEM budget (v5e/v6e: 128 MiB physical, v7x: 64 MiB/TC).
    cap = _vmem_capacity_bytes()
    budget = int(0.60 * cap)          # tile-selection budget (headroom for Mosaic)
    vmem_limit = int(0.75 * cap)      # scoped VMEM limit handed to the compiler

    TM, TN, M_pad = _select_tiling(M, K_pad, E_pad, a_item, w_item, o_item, budget)

    A = jnp.pad(A, ((0, M_pad - M), (0, K_pad - K)))

    grid = (M_pad // TM, E_pad // TN)

    out = pl.pallas_call(
        _patch_embed_kernel,
        out_shape=jax.ShapeDtypeStruct((M_pad, E_pad), out_dtype),
        grid=grid,
        in_specs=[
            pl.BlockSpec((TM, K_pad), lambda i, j: (i, 0)),   # A: streamed rows
            pl.BlockSpec((K_pad, TN), lambda i, j: (0, j)),   # W: resident/E-tiled
            pl.BlockSpec((1, TN), lambda i, j: (0, j)),       # bias (f32)
        ],
        out_specs=pl.BlockSpec((TM, TN), lambda i, j: (i, j)),
        compiler_params=pltpu.CompilerParams(
            dimension_semantics=("parallel", "parallel"),     # megacore on v7x
            allow_input_fusion=[True, False, False],          # fuse patch transpose
            vmem_limit_bytes=vmem_limit,
        ),
        cost_estimate=pl.CostEstimate(
            flops=2 * M_pad * K_pad * E_pad,
            transcendentals=0,
            bytes_accessed=(a_item * M_pad * K_pad
                            + w_item * K_pad * E_pad
                            + o_item * M_pad * E_pad),
        ),
    )(A, w_mat, b_mat)

    # Drop padding; (M, E) -> (B, num_patches, E) == flatten(2).transpose(1,2).
    # (If the consumer can absorb E_pad / bf16 directly, fuse this slice there.)
    return out[:M, :E].reshape(B, num_patches, E)


if __name__ == "__main__":
    # Small shapes consistent with the module: img_size=16, patch_size=4,
    # in_chans=4, embed_dim=32, batch=2  -> num_patches = 16.
    B, C, H, W = 2, 4, 16, 16
    P, E = 4, 32

    key = jax.random.PRNGKey(0)
    kx, kw, kb = jax.random.split(key, 3)

    x = jax.random.normal(kx, (B, C, H, W), dtype=jnp.float32)
    # Deterministic synthetic parameters (Conv2d weight/bias shapes from __init__).
    weight = jax.random.normal(kw, (E, C, P, P), dtype=jnp.float32) * 0.02
    bias = jax.random.normal(kb, (E,), dtype=jnp.float32) * 0.02

    # Reference: conv-as-matmul in plain JAX (matches PyTorch Conv2d k=stride=P).
    hp, wp = H // P, W // P
    A_ref = (x.reshape(B, C, hp, P, wp, P)
              .transpose(0, 2, 4, 1, 3, 5)
              .reshape(B * hp * wp, C * P * P))
    y_ref = (A_ref @ weight.reshape(E, -1).T + bias).reshape(B, hp * wp, E)

    # 1) Exact-numerics path (f32 operands/output) -> tight tolerance.
    w32, b32 = prepare_patch_embed_params(weight, bias, compute_dtype=jnp.float32)
    y32 = patch_embed_forward(x, w32, b32, patch_size=P, embed_dim=E,
                              compute_dtype=jnp.float32, out_dtype=jnp.float32)
    y32 = jax.block_until_ready(y32)
    assert y32.shape == (B, hp * wp, E), y32.shape
    assert jnp.allclose(y32, y_ref, atol=1e-5, rtol=1e-5), float(
        jnp.max(jnp.abs(y32 - y_ref)))

    # 2) Recommended fast path (bf16 operands/output, f32 accumulation).
    wbf, bbf = prepare_patch_embed_params(weight, bias)  # bf16 default
    ybf = patch_embed_forward(x, wbf, bbf, patch_size=P, embed_dim=E)
    ybf = jax.block_until_ready(ybf)
    assert ybf.shape == (B, hp * wp, E), ybf.shape
    err = float(jnp.max(jnp.abs(ybf.astype(jnp.float32) - y_ref)))
    assert jnp.allclose(ybf.astype(jnp.float32), y_ref, atol=3e-2, rtol=3e-2), err

    print("KERNEL_OK")
</pallas_src>

<mosaic_0001>
module attributes {stable_mosaic.version = 11 : i64} {
  func.func @_patch_embed_kernel(%arg0: i32, %arg1: i32, %arg2: memref<128x128xf32, #tpu.memory_space<vmem>>, %arg3: memref<128x128xf32, #tpu.memory_space<vmem>>, %arg4: memref<1x128xf32, #tpu.memory_space<vmem>>, %arg5: memref<128x128xf32, #tpu.memory_space<vmem>>) attributes {dimension_semantics = [#tpu.dimension_semantics<parallel>, #tpu.dimension_semantics<parallel>], iteration_bounds = array<i64: 1, 1>, scalar_prefetch = 0 : i64, scratch_operands = 0 : i64, tpu.core_type = #tpu.core_type<tc>, window_params = [{transform_indices = @transform_0, window_bounds = array<i64: 128, 128>}, {transform_indices = @transform_1, window_bounds = array<i64: 128, 128>}, {transform_indices = @transform_2, window_bounds = array<i64: 1, 128>}, {transform_indices = @transform_3, window_bounds = array<i64: 128, 128>}]} {
    %c0 = arith.constant 0 : index
    %c0_0 = arith.constant 0 : index
    %0 = vector.load %arg2[%c0, %c0_0] : memref<128x128xf32, #tpu.memory_space<vmem>>, vector<128x128xf32>
    %c0_1 = arith.constant 0 : index
    %c0_2 = arith.constant 0 : index
    %1 = vector.load %arg3[%c0_1, %c0_2] : memref<128x128xf32, #tpu.memory_space<vmem>>, vector<128x128xf32>
    %cst = arith.constant dense<0.000000e+00> : vector<128x128xf32>
    %2 = tpu.matmul %0, %1, %cst {dimension_numbers = #tpu.dot_dimension_numbers<[1], [0], [0], [1], [0, 0, 1, 1], [], []>} : vector<128x128xf32>, vector<128x128xf32>, vector<128x128xf32> -> vector<128x128xf32>
    %c0_3 = arith.constant 0 : index
    %c0_4 = arith.constant 0 : index
    %3 = vector.load %arg4[%c0_3, %c0_4] : memref<1x128xf32, #tpu.memory_space<vmem>>, vector<1x128xf32>
    %4 = vector.broadcast %3 : vector<1x128xf32> to vector<128x128xf32>
    %5 = arith.addf %2, %4 : vector<128x128xf32>
    %c0_5 = arith.constant 0 : index
    %c0_6 = arith.constant 0 : index
    %6 = vector.load %arg5[%c0_5, %c0_6] : memref<128x128xf32, #tpu.memory_space<vmem>>, vector<128x128xf32>
    tpu.vector_store %arg5[%c0_5, %c0_6], %5 {strides = array<i32>} : memref<128x128xf32, #tpu.memory_space<vmem>>, vector<128x128xf32>,
    return
  }
  func.func @transform_0(%arg0: i32, %arg1: i32) -> (i32, i32) {
    %c0_i32 = arith.constant 0 : i32
    %c0_i32_0 = arith.constant 0 : i32
    return %arg0, %c0_i32 : i32, i32
  }
  func.func @transform_1(%arg0: i32, %arg1: i32) -> (i32, i32) {
    %c0_i32 = arith.constant 0 : i32
    %c0_i32_0 = arith.constant 0 : i32
    return %c0_i32, %arg1 : i32, i32
  }
  func.func @transform_2(%arg0: i32, %arg1: i32) -> (i32, i32) {
    %c0_i32 = arith.constant 0 : i32
    %c0_i32_0 = arith.constant 0 : i32
    return %c0_i32, %arg1 : i32, i32
  }
  func.func @transform_3(%arg0: i32, %arg1: i32) -> (i32, i32) {
    %c0_i32 = arith.constant 0 : i32
    return %arg0, %arg1 : i32, i32
  }
}

</mosaic_0001>

<bundles_post_ra>
// kernel: patch_embed_forward.2
= control target key start
LH: loop header
LB: loop body
LE: loop exit
PB: predicated region body
PF: predicated region fallthrough
CT: control target
= control target key end

     0   :  { %v17_v13 = vlaneseq  ;;  %s440_s0 = inlined_call_operand.vmem [shape: f32[128,128], index: 0, kind: input, shape index: {}]   ;;  %s441_s1 = inlined_call_operand.vmem [shape: f32[1,128], index: 1, kind: input, shape index: {}]   ;;  %s442_s2 = inlined_call_operand.vmem [shape: f32[32,64], index: 2, kind: input, shape index: {}]   ;;  %s443_s3 = inlined_call_operand.<no memory space> [shape: f32[], index: 3, kind: input, shape index: {}]   ;;  %s444_s4 = inlined_call_operand.vmem [shape: f32[128,128], index: 4, kind: output, shape index: {}]  }
   0x1   :  { %v307_v0 = vstv %s443_s3  ;;  %v137_v1 = vld [vmem:[%s440_s0 + $0x78] sm:$0xff]  ;;  %v136_v2 = vld [vmem:[%s440_s0 + $0x70] sm:$0xff]  ;;  %v135_v3 = vld [vmem:[%s440_s0 + $0x68] sm:$0xff] }
   0x2   :  { %231 = vmatpush.msra.mxu2 %v137_v1  ;;  %232 = vmatpush.msra.mxu3 %v137_v1  ;;  %v134_v4 = vld [vmem:[%s440_s0 + $0x60] sm:$0xff]  ;;  %v133_v5 = vld [vmem:[%s440_s0 + $0x58] sm:$0xff]  ;;  %v132_v6 = vld [vmem:[%s440_s0 + $0x50] sm:$0xff]  ;;  %v18_v16 = vand.u32 127, %v17_v13 }
   0x3   :  { %142 = vmatpush.msra.mxu0 %v137_v1  ;;  %230 = vmatpush.msra.mxu1 %v137_v1  ;;  %v131_v7 = vld [vmem:[%s440_s0 + $0x48] sm:$0xff]  ;;  %v130_v8 = vld [vmem:[%s440_s0 + $0x40] sm:$0xff]  ;;  %v129_v9 = vld [vmem:[%s440_s0 + $0x38] sm:$0xff] }
   0x4   :  { %234 = vmatpush.msra.mxu2 %v136_v2  ;;  %235 = vmatpush.msra.mxu3 %v136_v2  ;;  %v128_v10 = vld [vmem:[%s440_s0 + $0x30] sm:$0xff]  ;;  %v127_v11 = vld [vmem:[%s440_s0 + $0x28] sm:$0xff]  ;;  %v126_v12 = vld [vmem:[%s440_s0 + $0x20] sm:$0xff]  ;;  %vm20_vm0 = vcmp.lt.s32.totalorder %v18_v16, 64 }
   0x5   :  { %143 = vmatpush.msra.mxu0 %v136_v2  ;;  %233 = vmatpush.msra.mxu1 %v136_v2  ;;  %v125_v14 = vld [vmem:[%s440_s0 + $0x18] sm:$0xff]  ;;  %v124_v15 = vld [vmem:[%s440_s0 + $0x10] sm:$0xff]  ;;  %v123_v17 = vld [vmem:[%s440_s0 + $0x8] sm:$0xff] }
   0x6   :  { %237 = vmatpush.msra.mxu2 %v135_v3  ;;  %238 = vmatpush.msra.mxu3 %v135_v3  ;;  %v122_v18 = vld [vmem:[%s440_s0] sm:$0xff]  ;;  %v227_v21 = vld [vmem:[%s442_s2 + $0x8] sm:$0xff]  ;;  %v228_v23 = vld [vmem:[%s442_s2 + $0x10] sm:$0xff] }
   0x7   :  { %144 = vmatpush.msra.mxu0 %v135_v3  ;;  %236 = vmatpush.msra.mxu1 %v135_v3  ;;  %v16_v19 = vld [vmem:[%s442_s2] sm:$0xff]  ;;  %v31_v22 = vsel %vm20_vm0, %v227_v21, %v307_v0  ;;  %v42_v24 = vsel %vm20_vm0, %v228_v23, %v307_v0  ;;  %v229_v25 = vld [vmem:[%s442_s2 + $0x18] sm:$0xff] }
   0x8   :  { %240 = vmatpush.msra.mxu2 %v134_v4  ;;  %241 = vmatpush.msra.mxu3 %v134_v4  ;;  %v21_v20 = vsel %vm20_vm0, %v16_v19, %v307_v0  ;;  %v53_v26 = vsel %vm20_vm0, %v229_v25, %v307_v0  ;;  %v278_v27 = vld [vmem:[%s441_s1] ss:$0 sm:$0xff] }
   0x9   :  { %145 = vmatpush.msra.mxu0 %v134_v4  ;;  %239 = vmatpush.msra.mxu1 %v134_v4 }
   0xa   :  { %243 = vmatpush.msra.mxu2 %v133_v5  ;;  %244 = vmatpush.msra.mxu3 %v133_v5 }
   0xb   :  { %146 = vmatpush.msra.mxu0 %v133_v5  ;;  %242 = vmatpush.msra.mxu1 %v133_v5 }
   0xc   :  { %246 = vmatpush.msra.mxu2 %v132_v6  ;;  %247 = vmatpush.msra.mxu3 %v132_v6 }
   0xd   :  { %147 = vmatpush.msra.mxu0 %v132_v6  ;;  %245 = vmatpush.msra.mxu1 %v132_v6 }
   0xe   :  { %249 = vmatpush.msra.mxu2 %v131_v7  ;;  %250 = vmatpush.msra.mxu3 %v131_v7 }
   0xf   :  { %148 = vmatpush.msra.mxu0 %v131_v7  ;;  %248 = vmatpush.msra.mxu1 %v131_v7 }
  0x10   :  { %252 = vmatpush.msra.mxu2 %v130_v8  ;;  %253 = vmatpush.msra.mxu3 %v130_v8 }
  0x11   :  { %149 = vmatpush.msra.mxu0 %v130_v8  ;;  %251 = vmatpush.msra.mxu1 %v130_v8 }
  0x12   :  { %255 = vmatpush.msra.mxu2 %v129_v9  ;;  %256 = vmatpush.msra.mxu3 %v129_v9 }
  0x13   :  { %150 = vmatpush.msra.mxu0 %v129_v9  ;;  %254 = vmatpush.msra.mxu1 %v129_v9 }
  0x14   :  { %258 = vmatpush.msra.mxu2 %v128_v10  ;;  %259 = vmatpush.msra.mxu3 %v128_v10 }
  0x15   :  { %151 = vmatpush.msra.mxu0 %v128_v10  ;;  %257 = vmatpush.msra.mxu1 %v128_v10 }
  0x16   :  { %261 = vmatpush.msra.mxu2 %v127_v11  ;;  %262 = vmatpush.msra.mxu3 %v127_v11 }
  0x17   :  { %152 = vmatpush.msra.mxu0 %v127_v11  ;;  %260 = vmatpush.msra.mxu1 %v127_v11 }
  0x18   :  { %264 = vmatpush.msra.mxu2 %v126_v12  ;;  %265 = vmatpush.msra.mxu3 %v126_v12 }
  0x19   :  { %153 = vmatpush.msra.mxu0 %v126_v12  ;;  %263 = vmatpush.msra.mxu1 %v126_v12 }
  0x1a   :  { %267 = vmatpush.msra.mxu2 %v125_v14  ;;  %268 = vmatpush.msra.mxu3 %v125_v14 }
  0x1b   :  { %154 = vmatpush.msra.mxu0 %v125_v14  ;;  %266 = vmatpush.msra.mxu1 %v125_v14 }
  0x1c   :  { %270 = vmatpush.msra.mxu2 %v124_v15  ;;  %271 = vmatpush.msra.mxu3 %v124_v15 }
  0x1d   :  { %155 = vmatpush.msra.mxu0 %v124_v15  ;;  %269 = vmatpush.msra.mxu1 %v124_v15 }
  0x1e   :  { %273 = vmatpush.msra.mxu2 %v123_v17  ;;  %274 = vmatpush.msra.mxu3 %v123_v17 }
  0x1f   :  { %156 = vmatpush.msra.mxu0 %v123_v17  ;;  %272 = vmatpush.msra.mxu1 %v123_v17 }
  0x20   :  { %276 = vmatpush.msra.mxu2 %v122_v18  ;;  %277 = vmatpush.msra.mxu3 %v122_v18 }
  0x21   :  { %182 = vmatmul.f32.vlgmr.msra.gmra.mxu2 %v307_v0  ;;  %194 = vmatmul.f32.vlgmr.msra.gmra.mxu3 %v307_v0 }
  0x22   :  { %157 = vmatpush.msra.mxu0 %v122_v18  ;;  %275 = vmatpush.msra.mxu1 %v122_v18 }
  0x23   :  { %158 = vmatmul.f32.vlgmr.msra.gmra.mxu0 %v21_v20  ;;  %170 = vmatmul.f32.vlgmr.msra.gmra.mxu1 %v307_v0 }
  0x29   :  { %185 = vmatmul.f32.gmra.mxu2 %v307_v0  ;;  %197 = vmatmul.f32.gmra.mxu3 %v307_v0 }
  0x2b   :  { %161 = vmatmul.f32.gmra.mxu0 %v31_v22  ;;  %173 = vmatmul.f32.gmra.mxu1 %v307_v0 }
  0x31   :  { %188 = vmatmul.f32.gmra.mxu2 %v307_v0  ;;  %200 = vmatmul.f32.gmra.mxu3 %v307_v0 }
  0x33   :  { %164 = vmatmul.f32.gmra.mxu0 %v42_v24  ;;  %176 = vmatmul.f32.gmra.mxu1 %v307_v0 }
  0x39   :  { %191 = vmatmul.f32.gmra.mxu2 %v307_v0  ;;  %203 = vmatmul.f32.gmra.mxu3 %v307_v0 }
  0x3b   :  { %167 = vmatmul.f32.gmra.mxu0 %v53_v26  ;;  %179 = vmatmul.f32.gmra.mxu1 %v307_v0 }
  0xa0   :  { %v159_v28 = vpop.f32.mrf.mxu0  ;;  %v171_v29 = vpop.f32.mrf.mxu1 }
  0xa1   :  { %v160_v30 = vadd.f32 %v278_v27, %v159_v28  ;;  %v172_v31 = vadd.f32 %v278_v27, %v171_v29 }
  0xa3   :  { %207 = vst [vmem:[%s444_s4] sm:$0xff] %v160_v30 }
  0xa4   :  { %211 = vst [vmem:[%s444_s4 + $0x20] sm:$0xff] %v172_v31  ;;  %v183_v32 = vpop.f32.mrf.mxu2  ;;  %v195_v33 = vpop.f32.mrf.mxu3 }
  0xa5   :  { %v184_v34 = vadd.f32 %v278_v27, %v183_v32  ;;  %v196_v35 = vadd.f32 %v278_v27, %v195_v33 }
  0xa7   :  { %215 = vst [vmem:[%s444_s4 + $0x40] sm:$0xff] %v184_v34 }
  0xa8   :  { %219 = vst [vmem:[%s444_s4 + $0x60] sm:$0xff] %v196_v35  ;;  %v162_v36 = vpop.f32.mrf.mxu0  ;;  %v174_v37 = vpop.f32.mrf.mxu1 }
  0xa9   :  { %v163_v38 = vadd.f32 %v278_v27, %v162_v36  ;;  %v175_v39 = vadd.f32 %v278_v27, %v174_v37 }
  0xab   :  { %208 = vst [vmem:[%s444_s4 + $0x8] sm:$0xff] %v163_v38 }
  0xac   :  { %212 = vst [vmem:[%s444_s4 + $0x28] sm:$0xff] %v175_v39  ;;  %v186_v40 = vpop.f32.mrf.mxu2  ;;  %v198_v41 = vpop.f32.mrf.mxu3 }
  0xad   :  { %v187_v42 = vadd.f32 %v278_v27, %v186_v40  ;;  %v199_v43 = vadd.f32 %v278_v27, %v198_v41 }
  0xaf   :  { %216 = vst [vmem:[%s444_s4 + $0x48] sm:$0xff] %v187_v42 }
  0xb0   :  { %220 = vst [vmem:[%s444_s4 + $0x68] sm:$0xff] %v199_v43  ;;  %v165_v44 = vpop.f32.mrf.mxu0  ;;  %v177_v45 = vpop.f32.mrf.mxu1 }
  0xb1   :  { %v166_v46 = vadd.f32 %v278_v27, %v165_v44  ;;  %v178_v47 = vadd.f32 %v278_v27, %v177_v45 }
  0xb3   :  { %209 = vst [vmem:[%s444_s4 + $0x10] sm:$0xff] %v166_v46 }
  0xb4   :  { %213 = vst [vmem:[%s444_s4 + $0x30] sm:$0xff] %v178_v47  ;;  %v189_v48 = vpop.f32.mrf.mxu2  ;;  %v201_v49 = vpop.f32.mrf.mxu3 }
  0xb5   :  { %v190_v50 = vadd.f32 %v278_v27, %v189_v48  ;;  %v202_v51 = vadd.f32 %v278_v27, %v201_v49 }
  0xb7   :  { %217 = vst [vmem:[%s444_s4 + $0x50] sm:$0xff] %v190_v50 }
  0xb8   :  { %221 = vst [vmem:[%s444_s4 + $0x70] sm:$0xff] %v202_v51  ;;  %v168_v52 = vpop.f32.mrf.mxu0  ;;  %v180_v53 = vpop.f32.mrf.mxu1 }
  0xb9   :  { %v169_v54 = vadd.f32 %v278_v27, %v168_v52  ;;  %v181_v55 = vadd.f32 %v278_v27, %v180_v53 }
  0xbb   :  { %210 = vst [vmem:[%s444_s4 + $0x18] sm:$0xff] %v169_v54 }
  0xbc   :  { %214 = vst [vmem:[%s444_s4 + $0x38] sm:$0xff] %v181_v55  ;;  %v192_v56 = vpop.f32.mrf.mxu2  ;;  %v204_v57 = vpop.f32.mrf.mxu3 }
  0xbd   :  { %v193_v58 = vadd.f32 %v278_v27, %v192_v56  ;;  %v205_v59 = vadd.f32 %v278_v27, %v204_v57 }
  0xbf   :  { %218 = vst [vmem:[%s444_s4 + $0x58] sm:$0xff] %v193_v58 }
  0xc0   :  { %222 = vst [vmem:[%s444_s4 + $0x78] sm:$0xff] %v205_v59 }

</bundles_post_ra>
